<compile_context>
chip_gen: v6e
topology: v6e:2x2x1
jax: 0.10.0
libtpu: 0.0.40
codegen_flags: <defaults>
</compile_context>

<pallas_src>
import jax
import jax.numpy as jnp
from jax.experimental import pallas as pl
from jax.experimental.pallas import tpu as pltpu


def _round_up(x: int, m: int) -> int:
    return ((x + m - 1) // m) * m


def _qnet_kernel(x_ref, w1_ref, b1_ref, w2_ref, b2_ref, w3_ref, b3_ref, out_ref):
    """Fused 3-layer MLP: (Linear+ReLU) x 2 -> Linear.  bf16 matmuls, f32 accum."""
    x = x_ref[...].astype(jnp.bfloat16)

    # Layer 1: Linear(state_dim -> hidden) + ReLU   (Dropout = identity at eval)
    h = jnp.dot(x, w1_ref[...], preferred_element_type=jnp.float32) + b1_ref[...]
    h = jnp.maximum(h, 0.0)

    # Layer 2: Linear(hidden -> hidden) + ReLU      (Dropout = identity at eval)
    h = jnp.dot(h.astype(jnp.bfloat16), w2_ref[...],
                preferred_element_type=jnp.float32) + b2_ref[...]
    h = jnp.maximum(h, 0.0)

    # Output head: Linear(hidden -> action_dim_padded), lane-dense store.
    q = jnp.dot(h.astype(jnp.bfloat16), w3_ref[...],
                preferred_element_type=jnp.float32) + b3_ref[...]
    out_ref[...] = q.astype(out_ref.dtype)


@jax.jit
def qnetwork_forward(state, w1, b1, w2, b2, w3, b3):
    """Pallas forward pass of QNetwork.

    state: [B, state_dim] f32
    w1: [state_dim, hidden], b1: [1, hidden]
    w2: [hidden, hidden],    b2: [1, hidden]
    w3: [hidden, action_dim],b3: [1, action_dim]
    returns: [B, action_dim] f32
    """
    B, state_dim = state.shape
    hidden = w1.shape[1]
    action_dim = w3.shape[1]

    # ---- lane-dense output: pad action_dim up to a multiple of 128 lanes ----
    out_pad = _round_up(action_dim, 128)
    if out_pad != action_dim:
        w3p = jnp.zeros((hidden, out_pad), w3.dtype).at[:, :action_dim].set(w3)
        b3p = jnp.zeros((1, out_pad), b3.dtype).at[:, :action_dim].set(b3)
    else:
        w3p, b3p = w3, b3

    # ---- large batch tiles; pad batch internally so any B works ----
    if B <= 256:
        block_b = _round_up(B, 8)        # single grid step over the whole batch
    else:
        block_b = 256                    # fills MXU rows on v6e/v7x; 2x128 on v5e
    B_pad = _round_up(B, block_b)
    if B_pad != B:
        state_p = jnp.zeros((B_pad, state_dim), state.dtype).at[:B, :].set(state)
    else:
        state_p = state

    # bf16 weights: halves HBM->VMEM bytes; MXU-native input, f32 accumulation.
    w1b = w1.astype(jnp.bfloat16)
    w2b = w2.astype(jnp.bfloat16)
    w3b = w3p.astype(jnp.bfloat16)

    grid = (B_pad // block_b,)

    out = pl.pallas_call(
        _qnet_kernel,
        out_shape=jax.ShapeDtypeStruct((B_pad, out_pad), jnp.float32),
        grid=grid,
        in_specs=[
            # state tiled along the batch axis; weights/biases grid-invariant.
            pl.BlockSpec((block_b, state_dim), lambda i: (i, 0)),
            pl.BlockSpec((state_dim, hidden), lambda i: (0, 0)),
            pl.BlockSpec((1, hidden), lambda i: (0, 0)),
            pl.BlockSpec((hidden, hidden), lambda i: (0, 0)),
            pl.BlockSpec((1, hidden), lambda i: (0, 0)),
            pl.BlockSpec((hidden, out_pad), lambda i: (0, 0)),
            pl.BlockSpec((1, out_pad), lambda i: (0, 0)),
        ],
        out_specs=pl.BlockSpec((block_b, out_pad), lambda i: (i, 0)),
        compiler_params=pltpu.CompilerParams(
            dimension_semantics=("parallel",),
        ),
    )(state_p, w1b, b1, w2b, b2, w3b, b3p)

    return out[:B, :action_dim]


def _init_linear(key, fan_in, fan_out):
    """PyTorch-style uniform(-1/sqrt(fan_in), 1/sqrt(fan_in)) init."""
    kw, kb = jax.random.split(key)
    bound = 1.0 / jnp.sqrt(jnp.float32(fan_in))
    w = jax.random.uniform(kw, (fan_in, fan_out), jnp.float32, -bound, bound)
    b = jax.random.uniform(kb, (1, fan_out), jnp.float32, -bound, bound)
    return w, b


def _reference_forward_mixed(state, w1, b1, w2, b2, w3, b3):
    """Pure-JAX reference with the same bf16-inputs / f32-accum precision as the kernel."""
    def mm(x, w):
        return jnp.dot(x.astype(jnp.bfloat16), w.astype(jnp.bfloat16),
                       preferred_element_type=jnp.float32)
    h = jnp.maximum(mm(state, w1) + b1, 0.0)
    h = jnp.maximum(mm(h, w2) + b2, 0.0)
    return mm(h, w3) + b3


def _reference_forward_f32(state, w1, b1, w2, b2, w3, b3):
    h = jnp.maximum(state @ w1 + b1, 0.0)
    h = jnp.maximum(h @ w2 + b2, 0.0)
    return h @ w3 + b3


if __name__ == "__main__":
    # QNetwork(state_dim=32, action_dim=8, hidden_dim=128, num_layers=2)
    batch, state_dim, hidden_dim, action_dim = 16, 32, 128, 8

    key = jax.random.PRNGKey(0)
    k_x, k1, k2, k3 = jax.random.split(key, 4)

    state = jax.random.normal(k_x, (batch, state_dim), jnp.float32)
    w1, b1 = _init_linear(k1, state_dim, hidden_dim)
    w2, b2 = _init_linear(k2, hidden_dim, hidden_dim)
    w3, b3 = _init_linear(k3, hidden_dim, action_dim)

    q = qnetwork_forward(state, w1, b1, w2, b2, w3, b3)
    q = jax.block_until_ready(q)
    assert q.shape == (batch, action_dim)

    q_ref = _reference_forward_mixed(state, w1, b1, w2, b2, w3, b3)
    assert jnp.allclose(q, q_ref, atol=1e-4, rtol=1e-4), "mismatch vs mixed-precision reference"

    q_f32 = _reference_forward_f32(state, w1, b1, w2, b2, w3, b3)
    assert jnp.allclose(q, q_f32, atol=5e-2, rtol=5e-2), "mismatch vs f32 reference"

    # Odd batch size exercises the internal padding path (no caller-side padding needed).
    state_odd = jax.random.normal(k_x, (13, state_dim), jnp.float32)
    q_odd = jax.block_until_ready(qnetwork_forward(state_odd, w1, b1, w2, b2, w3, b3))
    q_odd_ref = _reference_forward_mixed(state_odd, w1, b1, w2, b2, w3, b3)
    assert q_odd.shape == (13, action_dim)
    assert jnp.allclose(q_odd, q_odd_ref, atol=1e-4, rtol=1e-4), "odd-batch mismatch"

    print("KERNEL_OK")
</pallas_src>

<mosaic_0001>
module attributes {stable_mosaic.version = 11 : i64} {
  func.func @_qnet_kernel(%arg0: i32, %arg1: memref<16x32xf32, #tpu.memory_space<vmem>>, %arg2: memref<32x128xbf16, #tpu.memory_space<vmem>>, %arg3: memref<1x128xf32, #tpu.memory_space<vmem>>, %arg4: memref<128x128xbf16, #tpu.memory_space<vmem>>, %arg5: memref<1x128xf32, #tpu.memory_space<vmem>>, %arg6: memref<128x128xbf16, #tpu.memory_space<vmem>>, %arg7: memref<1x128xf32, #tpu.memory_space<vmem>>, %arg8: memref<16x128xf32, #tpu.memory_space<vmem>>) attributes {dimension_semantics = [#tpu.dimension_semantics<parallel>], iteration_bounds = array<i64: 1>, scalar_prefetch = 0 : i64, scratch_operands = 0 : i64, tpu.core_type = #tpu.core_type<tc>, window_params = [{transform_indices = @transform_0, window_bounds = array<i64: 16, 32>}, {pipeline_mode = #tpu.pipeline_mode<synchronous>, transform_indices = @transform_1, window_bounds = array<i64: 32, 128>}, {pipeline_mode = #tpu.pipeline_mode<synchronous>, transform_indices = @transform_2, window_bounds = array<i64: 1, 128>}, {pipeline_mode = #tpu.pipeline_mode<synchronous>, transform_indices = @transform_3, window_bounds = array<i64: 128, 128>}, {pipeline_mode = #tpu.pipeline_mode<synchronous>, transform_indices = @transform_4, window_bounds = array<i64: 1, 128>}, {pipeline_mode = #tpu.pipeline_mode<synchronous>, transform_indices = @transform_5, window_bounds = array<i64: 128, 128>}, {pipeline_mode = #tpu.pipeline_mode<synchronous>, transform_indices = @transform_6, window_bounds = array<i64: 1, 128>}, {transform_indices = @transform_7, window_bounds = array<i64: 16, 128>}]} {
    %c0 = arith.constant 0 : index
    %c0_0 = arith.constant 0 : index
    %0 = vector.load %arg1[%c0, %c0_0] : memref<16x32xf32, #tpu.memory_space<vmem>>, vector<16x32xf32>
    %1 = arith.truncf %0 : vector<16x32xf32> to vector<16x32xbf16>
    %c0_1 = arith.constant 0 : index
    %c0_2 = arith.constant 0 : index
    %2 = vector.load %arg2[%c0_1, %c0_2] : memref<32x128xbf16, #tpu.memory_space<vmem>>, vector<32x128xbf16>
    %cst = arith.constant dense<0.000000e+00> : vector<16x128xf32>
    %3 = tpu.matmul %1, %2, %cst {dimension_numbers = #tpu.dot_dimension_numbers<[1], [0], [0], [1], [0, 0, 1, 1], [], []>} : vector<16x32xbf16>, vector<32x128xbf16>, vector<16x128xf32> -> vector<16x128xf32>
    %c0_3 = arith.constant 0 : index
    %c0_4 = arith.constant 0 : index
    %4 = vector.load %arg3[%c0_3, %c0_4] : memref<1x128xf32, #tpu.memory_space<vmem>>, vector<1x128xf32>
    %5 = vector.broadcast %4 : vector<1x128xf32> to vector<16x128xf32>
    %6 = arith.addf %3, %5 : vector<16x128xf32>
    %cst_5 = arith.constant 0.000000e+00 : f32
    %7 = vector.broadcast %cst_5 : f32 to vector<16x128xf32>
    %8 = arith.maximumf %6, %7 : vector<16x128xf32>
    %9 = arith.truncf %8 : vector<16x128xf32> to vector<16x128xbf16>
    %c0_6 = arith.constant 0 : index
    %c0_7 = arith.constant 0 : index
    %10 = vector.load %arg4[%c0_6, %c0_7] : memref<128x128xbf16, #tpu.memory_space<vmem>>, vector<128x128xbf16>
    %cst_8 = arith.constant dense<0.000000e+00> : vector<16x128xf32>
    %11 = tpu.matmul %9, %10, %cst_8 {dimension_numbers = #tpu.dot_dimension_numbers<[1], [0], [0], [1], [0, 0, 1, 1], [], []>} : vector<16x128xbf16>, vector<128x128xbf16>, vector<16x128xf32> -> vector<16x128xf32>
    %c0_9 = arith.constant 0 : index
    %c0_10 = arith.constant 0 : index
    %12 = vector.load %arg5[%c0_9, %c0_10] : memref<1x128xf32, #tpu.memory_space<vmem>>, vector<1x128xf32>
    %13 = vector.broadcast %12 : vector<1x128xf32> to vector<16x128xf32>
    %14 = arith.addf %11, %13 : vector<16x128xf32>
    %cst_11 = arith.constant 0.000000e+00 : f32
    %15 = vector.broadcast %cst_11 : f32 to vector<16x128xf32>
    %16 = arith.maximumf %14, %15 : vector<16x128xf32>
    %17 = arith.truncf %16 : vector<16x128xf32> to vector<16x128xbf16>
    %c0_12 = arith.constant 0 : index
    %c0_13 = arith.constant 0 : index
    %18 = vector.load %arg6[%c0_12, %c0_13] : memref<128x128xbf16, #tpu.memory_space<vmem>>, vector<128x128xbf16>
    %cst_14 = arith.constant dense<0.000000e+00> : vector<16x128xf32>
    %19 = tpu.matmul %17, %18, %cst_14 {dimension_numbers = #tpu.dot_dimension_numbers<[1], [0], [0], [1], [0, 0, 1, 1], [], []>} : vector<16x128xbf16>, vector<128x128xbf16>, vector<16x128xf32> -> vector<16x128xf32>
    %c0_15 = arith.constant 0 : index
    %c0_16 = arith.constant 0 : index
    %20 = vector.load %arg7[%c0_15, %c0_16] : memref<1x128xf32, #tpu.memory_space<vmem>>, vector<1x128xf32>
    %21 = vector.broadcast %20 : vector<1x128xf32> to vector<16x128xf32>
    %22 = arith.addf %19, %21 : vector<16x128xf32>
    %c0_17 = arith.constant 0 : index
    %c0_18 = arith.constant 0 : index
    %23 = vector.load %arg8[%c0_17, %c0_18] : memref<16x128xf32, #tpu.memory_space<vmem>>, vector<16x128xf32>
    tpu.vector_store %arg8[%c0_17, %c0_18], %22 {strides = array<i32>} : memref<16x128xf32, #tpu.memory_space<vmem>>, vector<16x128xf32>,
    return
  }
  func.func @transform_0(%arg0: i32) -> (i32, i32) {
    %c0_i32 = arith.constant 0 : i32
    %c0_i32_0 = arith.constant 0 : i32
    return %arg0, %c0_i32 : i32, i32
  }
  func.func @transform_1(%arg0: i32) -> (i32, i32) {
    %c0_i32 = arith.constant 0 : i32
    %c0_i32_0 = arith.constant 0 : i32
    %c0_i32_1 = arith.constant 0 : i32
    return %c0_i32, %c0_i32_0 : i32, i32
  }
  func.func @transform_2(%arg0: i32) -> (i32, i32) {
    %c0_i32 = arith.constant 0 : i32
    %c0_i32_0 = arith.constant 0 : i32
    %c0_i32_1 = arith.constant 0 : i32
    return %c0_i32, %c0_i32_0 : i32, i32
  }
  func.func @transform_3(%arg0: i32) -> (i32, i32) {
    %c0_i32 = arith.constant 0 : i32
    %c0_i32_0 = arith.constant 0 : i32
    %c0_i32_1 = arith.constant 0 : i32
    return %c0_i32, %c0_i32_0 : i32, i32
  }
  func.func @transform_4(%arg0: i32) -> (i32, i32) {
    %c0_i32 = arith.constant 0 : i32
    %c0_i32_0 = arith.constant 0 : i32
    %c0_i32_1 = arith.constant 0 : i32
    return %c0_i32, %c0_i32_0 : i32, i32
  }
  func.func @transform_5(%arg0: i32) -> (i32, i32) {
    %c0_i32 = arith.constant 0 : i32
    %c0_i32_0 = arith.constant 0 : i32
    %c0_i32_1 = arith.constant 0 : i32
    return %c0_i32, %c0_i32_0 : i32, i32
  }
  func.func @transform_6(%arg0: i32) -> (i32, i32) {
    %c0_i32 = arith.constant 0 : i32
    %c0_i32_0 = arith.constant 0 : i32
    %c0_i32_1 = arith.constant 0 : i32
    return %c0_i32, %c0_i32_0 : i32, i32
  }
  func.func @transform_7(%arg0: i32) -> (i32, i32) {
    %c0_i32 = arith.constant 0 : i32
    %c0_i32_0 = arith.constant 0 : i32
    return %arg0, %c0_i32 : i32, i32
  }
}

</mosaic_0001>

<bundles_post_ra>
// kernel: qnetwork_forward.1
= control target key start
LH: loop header
LB: loop body
LE: loop exit
PB: predicated region body
PF: predicated region fallthrough
CT: control target
= control target key end

     0   :  { %v445_v0 = vmov 0.0   ;;  %vm446_vm0 = vmmov 0   ;;  %vm53_vm1 = vcmask 261120   ;;  %s586_s1 = inlined_call_operand.vmem [shape: bf16[32,128], index: 1, kind: input, shape index: {}]   ;;  %s587_s0 = inlined_call_operand.vmem [shape: f32[16,32], index: 0, kind: input, shape index: {}]   ;;  %s588_s3 = inlined_call_operand.vmem [shape: bf16[128,128], index: 3, kind: input, shape index: {}]   ;;  %s589_s5 = inlined_call_operand.vmem [shape: bf16[128,128], index: 5, kind: input, shape index: {}]   ;;  %s590_s2 = inlined_call_operand.vmem [shape: f32[1,128], index: 2, kind: input, shape index: {}]   ;;  %s591_s4 = inlined_call_operand.vmem [shape: f32[1,128], index: 4, kind: input, shape index: {}]   ;;  %s592_s6 = inlined_call_operand.vmem [shape: f32[1,128], index: 6, kind: input, shape index: {}]   ;;  %s593_s7 = inlined_call_operand.vmem [shape: f32[16,128], index: 7, kind: output, shape index: {}]  }
   0x1   :  { %377 = vmatprep.subr.bf16.mxu0 %v445_v0  ;;  %v427_v1 = vld [vmem:[%s586_s1 + $0x8] sm:$0xff]   ;;  %381 = vmatprep.mubr.msk.bf16.mxu0 %vm446_vm0, %v445_v0  ;;  %v428_v2 = vld [vmem:[%s586_s1] sm:$0xff]   ;;  %v429_v5 = vld [vmem:[%s588_s3 + $0x38] sm:$0xff]  }
   0x2   :  { %385 = vmatprep.subr.bf16.mxu1 %v445_v0  ;;  %401 = vmatprep.mubr.msk.bf16.mxu1 %vm446_vm0, %v445_v0  ;;  %v27_v3 = vld [vmem:[%s587_s0] sm:$0xff]  ;;  %v28_v4 = vld [vmem:[%s587_s0 + $0x8] sm:$0xff]  ;;  %v430_v7 = vld [vmem:[%s588_s3 + $0x30] sm:$0xff]  }
   0x3   :  { %378 = vmatpush3.bf16.msra.mxu0 %v427_v1  ;;  %v29_v6 = vpack.c.bf16 %v28_v4, %v27_v3  ;;  %386 = vmatpush3.bf16.msra.mxu1 %v429_v5  ;;  %v431_v8 = vld [vmem:[%s588_s3 + $0x28] sm:$0xff]   ;;  %v432_v9 = vld [vmem:[%s588_s3 + $0x20] sm:$0xff]   ;;  %v433_v10 = vld [vmem:[%s588_s3 + $0x18] sm:$0xff]  }
   0x4   :  { %379 = vmatprep.subr.bf16.mxu0 %v445_v0  ;;  %387 = vmatprep.subr.bf16.mxu1 %v445_v0  ;;  %v434_v11 = vld [vmem:[%s588_s3 + $0x10] sm:$0xff]   ;;  %v435_v12 = vld [vmem:[%s588_s3 + $0x8] sm:$0xff]   ;;  %v436_v13 = vld [vmem:[%s588_s3] sm:$0xff]  }
   0x5   :  { %v437_v14 = vld [vmem:[%s589_s5 + $0x38] sm:$0xff]   ;;  %v438_v15 = vld [vmem:[%s589_s5 + $0x30] sm:$0xff]   ;;  %v439_v16 = vld [vmem:[%s589_s5 + $0x28] sm:$0xff]  }
   0x6   :  { %v440_v17 = vld [vmem:[%s589_s5 + $0x20] sm:$0xff]   ;;  %v441_v18 = vld [vmem:[%s589_s5 + $0x18] sm:$0xff]   ;;  %v442_v29 = vld [vmem:[%s589_s5 + $0x10] sm:$0xff]  }
   0x7   :  { %380 = vmatpush3.bf16.msra.mxu0 %v428_v2  ;;  %388 = vmatpush3.bf16.msra.mxu1 %v430_v7  ;;  %v334_v19 = vld [vmem:[%s590_s2] ss:$0 sm:$0xff]  ;;  %v443_v30 = vld [vmem:[%s589_s5 + $0x8] sm:$0xff]  }
   0x8   :  { %405 = vmatprep.subr.bf16.mxu0 %v445_v0  ;;  %389 = vmatprep.subr.bf16.mxu1 %v445_v0  ;;  %v444_v31 = vld [vmem:[%s589_s5] sm:$0xff]  }
   0x9   :  { %v338_v32 = vld [vmem:[%s591_s4] ss:$0 sm:$0xff] }
   0xa   :  { %382 = vmatmul.mubr.msk.bf16.vlgmr.msra.gmra.mxu0 %vm53_vm1, %v29_v6  ;;  %v347_v42 = vld [vmem:[%s592_s6] ss:$0 sm:$0xff] }
   0xb   :  { %421 = vmatprep.mubr.msk.bf16.mxu0 %vm446_vm0, %v445_v0  ;;  %390 = vmatpush3.bf16.msra.mxu1 %v431_v8 }
   0xc   :  { %391 = vmatprep.subr.bf16.mxu1 %v445_v0  ;;  %406 = vmatpush3.bf16.msra.mxu0 %v437_v14 }
   0xd   :  { %407 = vmatprep.subr.bf16.mxu0 %v445_v0 }
   0xf   :  { %392 = vmatpush3.bf16.msra.mxu1 %v432_v9 }
  0x10   :  { %393 = vmatprep.subr.bf16.mxu1 %v445_v0  ;;  %408 = vmatpush3.bf16.msra.mxu0 %v438_v15 }
  0x11   :  { %409 = vmatprep.subr.bf16.mxu0 %v445_v0 }
  0x13   :  { %394 = vmatpush3.bf16.msra.mxu1 %v433_v10 }
  0x14   :  { %395 = vmatprep.subr.bf16.mxu1 %v445_v0  ;;  %410 = vmatpush3.bf16.msra.mxu0 %v439_v16 }
  0x15   :  { %411 = vmatprep.subr.bf16.mxu0 %v445_v0 }
  0x17   :  { %396 = vmatpush3.bf16.msra.mxu1 %v434_v11 }
  0x18   :  { %397 = vmatprep.subr.bf16.mxu1 %v445_v0  ;;  %412 = vmatpush3.bf16.msra.mxu0 %v440_v17 }
  0x19   :  { %413 = vmatprep.subr.bf16.mxu0 %v445_v0 }
  0x1b   :  { %398 = vmatpush3.bf16.msra.mxu1 %v435_v12 }
  0x1c   :  { %399 = vmatprep.subr.bf16.mxu1 %v445_v0  ;;  %414 = vmatpush3.bf16.msra.mxu0 %v441_v18 }
  0x1d   :  { %415 = vmatprep.subr.bf16.mxu0 %v445_v0 }
  0x1f   :  { %400 = vmatpush3.bf16.msra.mxu1 %v436_v13 }
  0x20   :  { %416 = vmatpush3.bf16.msra.mxu0 %v442_v29 }
  0x21   :  { %417 = vmatprep.subr.bf16.mxu0 %v445_v0 }
  0x24   :  { %418 = vmatpush3.bf16.msra.mxu0 %v443_v30 }
  0x25   :  { %419 = vmatprep.subr.bf16.mxu0 %v445_v0 }
  0x28   :  { %420 = vmatpush3.bf16.msra.mxu0 %v444_v31 }
  0xca   :  { %v91_v20 = vpop.f32.mrf.mxu0 }
  0xcb   :  { %v92_v22 = vadd.f32 %v334_v19, %v91_v20 }
  0xcc   :  { %v383_v21 = vpop.f32.mrf.mxu0 }
  0xcd   :  { %v98_v26 = vmax.f32 %v92_v22, 0.0 }
  0xce   :  { %v94_v23 = vpop.f32.mrf.mxu0 }
  0xcf   :  { %v95_v24 = vadd.f32 %v334_v19, %v94_v23 }
  0xd0   :  { %v384_v25 = vpop.f32.mrf.mxu0 }
  0xd1   :  { %v99_v27 = vmax.f32 %v95_v24, 0.0 }
  0xd3   :  { %v100_v28 = vpack.c.bf16 %v99_v27, %v98_v26 }
  0xd5   :  { %402 = vmatmul.mubr.bf16.vlgmr.msra.gmra.mxu1 %v100_v28 }
 0x195   :  { %v206_v33 = vpop.f32.mrf.mxu1 }
 0x196   :  { %v207_v35 = vadd.f32 %v338_v32, %v206_v33 }
 0x197   :  { %v403_v34 = vpop.f32.mrf.mxu1 }
 0x198   :  { %v213_v39 = vmax.f32 %v207_v35, 0.0 }
 0x199   :  { %v209_v36 = vpop.f32.mrf.mxu1 }
 0x19a   :  { %v210_v37 = vadd.f32 %v338_v32, %v209_v36 }
 0x19b   :  { %v404_v38 = vpop.f32.mrf.mxu1 }
 0x19c   :  { %v214_v40 = vmax.f32 %v210_v37, 0.0 }
 0x19e   :  { %v215_v41 = vpack.c.bf16 %v214_v40, %v213_v39 }
 0x1a0   :  { %422 = vmatmul.mubr.bf16.vlgmr.msra.gmra.mxu0 %v215_v41 }
 0x260   :  { %v321_v43 = vpop.f32.mrf.mxu0 }
 0x261   :  { %v322_v44 = vadd.f32 %v347_v42, %v321_v43 }
 0x262   :  { %v423_v45 = vpop.f32.mrf.mxu0 }
 0x263   :  { %328 = vst [vmem:[%s593_s7] sm:$0xff] %v322_v44 }
 0x264   :  { %v324_v46 = vpop.f32.mrf.mxu0 }
 0x265   :  { %v325_v47 = vadd.f32 %v347_v42, %v324_v46 }
 0x266   :  { %v424_v48 = vpop.f32.mrf.mxu0 }
 0x267   :  { %329 = vst [vmem:[%s593_s7 + $0x8] sm:$0xff] %v325_v47 }

</bundles_post_ra>
